<compile_context>
chip_gen: v6e
topology: v6e:2x2x1
jax: 0.10.0
libtpu: 0.0.40
codegen_flags: <defaults>
</compile_context>

<pallas_src>
import functools
import math

import jax
import jax.numpy as jnp
from jax.experimental import pallas as pl
from jax.experimental.pallas import tpu as pltpu


# ---------------------------------------------------------------------------
# Budgets (sized for the tightest generation, v7x: 64 MiB physical VMEM per TC)
# ---------------------------------------------------------------------------
_MAX_BATCH_TILE = 1024            # rows per grid step before VMEM-driven fallback
_MIN_SPLIT_ROWS = 64              # batch size above which we force grid >= 2 (megacore)
_VMEM_TILE_BUDGET = 48 * 2**20    # working-set budget, headroom below 64 MiB physical
_WEIGHT_2XBUF_LIMIT = 16 * 2**20  # above this, stop double-buffering resident weights
_WEIGHT_RESIDENT_BUDGET = 40 * 2**20  # f32 weights above this auto-fall back to bf16


# ---------------------------------------------------------------------------
# Kernel
# ---------------------------------------------------------------------------
def _policy_kernel(state_ref, w1_ref, b1_ref, w2_ref, b2_ref, w3_ref, b3_ref,
                   scale_ref, bias_ref, out_ref):
    # state block: (TB, Dp_obs).  Weights may be f32 or bf16; MXU operands are cast to
    # the weight dtype, accumulation is f32, all elementwise math stays f32 (v5e-safe).
    x = state_ref[...].astype(w1_ref.dtype)

    h1 = jnp.dot(x, w1_ref[...], preferred_element_type=jnp.float32) + b1_ref[...]
    h1 = jnp.maximum(h1, 0.0).astype(w2_ref.dtype)

    h2 = jnp.dot(h1, w2_ref[...], preferred_element_type=jnp.float32) + b2_ref[...]
    h2 = jnp.maximum(h2, 0.0).astype(w3_ref.dtype)

    m = jnp.dot(h2, w3_ref[...], preferred_element_type=jnp.float32) + b3_ref[...]
    # scale/bias are (1, Dp_act) lane vectors -> broadcast over the batch sublanes.
    out_ref[...] = (jnp.tanh(m) * scale_ref[...] + bias_ref[...]).astype(out_ref.dtype)


# ---------------------------------------------------------------------------
# Padding helpers + parameter preparation (done once, reused across calls)
# ---------------------------------------------------------------------------
def _round_up(x, m):
    return ((x + m - 1) // m) * m


def _pad2d(a, rows, cols, value=0.0):
    return jnp.pad(a, ((0, rows - a.shape[0]), (0, cols - a.shape[1])),
                   constant_values=value)


def prepare_params(params, action_scale=1.0, action_bias=0.0, *, dtype=jnp.float32):
    """Pad weights/biases and the action scale/bias once to lane-dense shapes.

    params: w1 (d_obs, H), b1 (1, H), w2 (H, H), b2 (1, H), w3 (H, d_act), b3 (1, d_act)
            (weights already in (in, out) layout, i.e. torch weight transposed).
    action_scale / action_bias: scalar or (d_act,) -- stored as padded (1, Dp_act)
            lane vectors so they are data (no Mosaic recompile per value).
    dtype:  weight dtype fed to the MXU.  jnp.bfloat16 is MXU-native on v5e, v6e AND
            v7x and halves weight DMA + resident VMEM; all elementwise math stays f32
            in the kernel, so bf16 weights are safe on v5e too (no bf16 VPU/EUP used).
    Zero padding keeps the math identical to the unpadded network (padded lanes stay
    exactly 0 through relu/tanh and are sliced off; scale pads with 1.0, bias with 0.0).
    """
    d_obs, H = params["w1"].shape
    d_act = params["w3"].shape[1]
    dp_obs = _round_up(d_obs, 128)
    hp = _round_up(H, 128)
    dp_act = _round_up(d_act, 128)

    # Keep the whole weight set VMEM-resident even on v7x (64 MiB): if f32 weights are
    # too large, fall back to bf16 automatically instead of silently re-streaming them.
    w_bytes_f32 = 4 * (dp_obs * hp + hp * hp + hp * dp_act)
    if dtype == jnp.float32 and w_bytes_f32 > _WEIGHT_RESIDENT_BUDGET:
        dtype = jnp.bfloat16
    # TODO(synk): fp8 weight option for v7x (no int8 MXU there) and K-tiling of w2 for
    # hidden dims where even bf16 weights crowd 64 MiB VMEM.

    scale = jnp.broadcast_to(
        jnp.asarray(action_scale, jnp.float32).reshape(-1), (d_act,))
    bias = jnp.broadcast_to(
        jnp.asarray(action_bias, jnp.float32).reshape(-1), (d_act,))

    return {
        "w1": _pad2d(params["w1"], dp_obs, hp).astype(dtype),
        "b1": _pad2d(params["b1"], 1, hp).astype(jnp.float32),
        "w2": _pad2d(params["w2"], hp, hp).astype(dtype),
        "b2": _pad2d(params["b2"], 1, hp).astype(jnp.float32),
        "w3": _pad2d(params["w3"], hp, dp_act).astype(dtype),
        "b3": _pad2d(params["b3"], 1, dp_act).astype(jnp.float32),
        "scale": jnp.pad(scale, (0, dp_act - d_act),
                         constant_values=1.0).reshape(1, dp_act),
        "bias": jnp.pad(bias, (0, dp_act - d_act)).reshape(1, dp_act),
        "d_obs": d_obs,
        "d_act": d_act,
    }


# ---------------------------------------------------------------------------
# VMEM / tiling heuristics
# ---------------------------------------------------------------------------
def _vmem_bytes_estimate(tb, dp_obs, hp, dp_act, w_bytes, w_bufs):
    f32 = 4
    io = 2 * tb * (dp_obs + dp_act) * f32          # double-buffered state/out tiles
    act = tb * (dp_obs + 2 * hp + dp_act) * f32    # in-flight activations (rough)
    small = 8 * (hp + dp_act) * f32                # biases + scale/bias
    return w_bufs * w_bytes + io + act + small


def _choose_batch_tile(bp, dp_obs, hp, dp_act, w_bytes, w_bufs):
    # Divisor-friendly tiling at the cap: waste stays < 8 rows instead of up to a tile.
    n_tiles = pl.cdiv(bp, _MAX_BATCH_TILE)
    if n_tiles == 1 and bp >= _MIN_SPLIT_ROWS:
        n_tiles = 2        # grid >= 2 so "parallel" shards across v7x's 2 TensorCores
    tb = _round_up(pl.cdiv(bp, n_tiles), 8)
    # Only fall back to smaller tiles when VMEM demands it.
    while tb > 8 and _vmem_bytes_estimate(
            tb, dp_obs, hp, dp_act, w_bytes, w_bufs) > _VMEM_TILE_BUDGET:
        tb = _round_up(pl.cdiv(tb, 2), 8)
    return tb


# ---------------------------------------------------------------------------
# Forward wrapper (jitted: pad -> pallas_call -> slice is a single dispatch)
# ---------------------------------------------------------------------------
@functools.partial(jax.jit, static_argnames=("d_obs", "d_act"))
def _forward_impl(state, w1, b1, w2, b2, w3, b3, scale_p, bias_p, *, d_obs, d_act):
    dp_obs, hp = w1.shape
    dp_act = w3.shape[1]

    B = state.shape[0]
    bp = _round_up(max(B, 1), 8)

    w_bytes = sum(int(w.size) * w.dtype.itemsize for w in (w1, w2, w3))
    single_buffer_weights = 2 * w_bytes > _WEIGHT_2XBUF_LIMIT
    w_bufs = 1 if single_buffer_weights else 2

    tb = _choose_batch_tile(bp, dp_obs, hp, dp_act, w_bytes, w_bufs)
    grid = (pl.cdiv(bp, tb),)
    bp = grid[0] * tb

    # Feature-pad + sublane-pad the state (kept inside this jit: no per-call dispatch).
    # TODO(synk): for very large batches, widen from an unpadded (tb, d_obs) block
    # in-kernel instead, to skip this extra HBM pass over the padded state copy.
    state_p = jnp.pad(state.astype(jnp.float32), ((0, bp - B), (0, dp_obs - d_obs)))

    def _resident_spec(shape):
        # Grid-invariant operands: constant index_map keeps them VMEM-resident across
        # the batch grid.  Single-buffer them once they are large (double-buffering
        # big weights is pure VMEM waste and decisive on v7x's 64 MiB as H grows).
        if single_buffer_weights:
            return pl.BlockSpec(shape, lambda i: (0, 0), pipeline_mode=pl.Buffered(1))
        return pl.BlockSpec(shape, lambda i: (0, 0))

    vmem_limit = int(min(
        64 * 2**20,
        max(2 * _vmem_bytes_estimate(tb, dp_obs, hp, dp_act, w_bytes, w_bufs),
            32 * 2**20)))

    out_p = pl.pallas_call(
        _policy_kernel,
        out_shape=jax.ShapeDtypeStruct((bp, dp_act), jnp.float32),
        grid=grid,
        in_specs=[
            pl.BlockSpec((tb, dp_obs), lambda i: (i, 0)),   # state: walks the batch
            _resident_spec(w1.shape),
            _resident_spec(b1.shape),
            _resident_spec(w2.shape),
            _resident_spec(b2.shape),
            _resident_spec(w3.shape),
            _resident_spec(b3.shape),
            _resident_spec(scale_p.shape),                  # action_scale
            _resident_spec(bias_p.shape),                   # action_bias
        ],
        out_specs=pl.BlockSpec((tb, dp_act), lambda i: (i, 0)),
        compiler_params=pltpu.CompilerParams(
            dimension_semantics=("parallel",),
            vmem_limit_bytes=vmem_limit),
    )(state_p, w1, b1, w2, b2, w3, b3, scale_p, bias_p)

    return out_p[:B, :d_act]


def deterministic_policy_forward(state, prepared):
    """Fused 3-layer MLP policy forward.  state: (B, d_obs) -> (B, d_act) float32."""
    return _forward_impl(
        state,
        prepared["w1"], prepared["b1"], prepared["w2"], prepared["b2"],
        prepared["w3"], prepared["b3"], prepared["scale"], prepared["bias"],
        d_obs=prepared["d_obs"], d_act=prepared["d_act"])


# ---------------------------------------------------------------------------
# Init + pure-JAX reference
# ---------------------------------------------------------------------------
def xavier_uniform(key, fan_in, fan_out, gain=1.0):
    # Matches torch.nn.init.xavier_uniform_; stored as (in, out).
    bound = gain * math.sqrt(6.0 / (fan_in + fan_out))
    return jax.random.uniform(key, (fan_in, fan_out), jnp.float32, -bound, bound)


def init_params(key, d_obs, d_act, hidden_dim):
    k1, k2, k3 = jax.random.split(key, 3)
    return {
        "w1": xavier_uniform(k1, d_obs, hidden_dim),
        "b1": jnp.zeros((1, hidden_dim), jnp.float32),
        "w2": xavier_uniform(k2, hidden_dim, hidden_dim),
        "b2": jnp.zeros((1, hidden_dim), jnp.float32),
        "w3": xavier_uniform(k3, hidden_dim, d_act),
        "b3": jnp.zeros((1, d_act), jnp.float32),
    }


def reference_forward(state, params, action_scale=1.0, action_bias=0.0):
    h1 = jax.nn.relu(state @ params["w1"] + params["b1"])
    h2 = jax.nn.relu(h1 @ params["w2"] + params["b2"])
    scale = jnp.asarray(action_scale, jnp.float32)
    bias = jnp.asarray(action_bias, jnp.float32)
    return jnp.tanh(h2 @ params["w3"] + params["b3"]) * scale + bias


# TODO(synk): DeterministicPolicy.sample() uses torch's in-place stateful noise
# (self.noise.normal_); only forward() is implemented here.

if __name__ == "__main__":
    key = jax.random.PRNGKey(0)
    k_param, k_state, k_state2 = jax.random.split(key, 3)

    d_obs, d_act, hidden = 4, 2, 32
    raw_params = init_params(k_param, d_obs, d_act, hidden)

    # Per-dimension scale/bias (as the torch module's env-derived tensors would be).
    action_scale = jnp.array([1.0, 0.5], jnp.float32)
    action_bias = jnp.array([0.0, 0.1], jnp.float32)

    # ---- f32 path, tiny inference batch ------------------------------------
    prep_f32 = prepare_params(raw_params, action_scale, action_bias,
                              dtype=jnp.float32)
    state = jax.random.normal(k_state, (2, d_obs), jnp.float32)
    out = jax.block_until_ready(deterministic_policy_forward(state, prep_f32))
    ref = reference_forward(state, raw_params, action_scale, action_bias)
    assert out.shape == (2, d_act)
    assert jnp.allclose(out, ref, atol=1e-5, rtol=1e-5)

    # Same compiled kernel + jit cache, different scale/bias values (data, not consts).
    prep_f32_b = prepare_params(raw_params, 2.0, -0.25, dtype=jnp.float32)
    out2 = jax.block_until_ready(deterministic_policy_forward(state, prep_f32_b))
    ref2 = reference_forward(state, raw_params, 2.0, -0.25)
    assert jnp.allclose(out2, ref2, atol=1e-5, rtol=1e-5)

    # ---- bf16-weight path (MXU-native on v5e/v6e/v7x), larger batch -> grid of 2 ----
    prep_bf16 = prepare_params(raw_params, action_scale, action_bias,
                               dtype=jnp.bfloat16)
    state_big = jax.random.normal(k_state2, (512, d_obs), jnp.float32)
    out_big = jax.block_until_ready(
        deterministic_policy_forward(state_big, prep_bf16))
    ref_big = reference_forward(state_big, raw_params, action_scale, action_bias)
    assert out_big.shape == (512, d_act)
    assert jnp.allclose(out_big, ref_big, atol=2e-2, rtol=2e-2)

    print("KERNEL_OK")
</pallas_src>

<mosaic_0001>
module attributes {stable_mosaic.version = 11 : i64} {
  func.func @_policy_kernel(%arg0: i32, %arg1: memref<8x128xf32, #tpu.memory_space<vmem>>, %arg2: memref<128x128xf32, #tpu.memory_space<vmem>>, %arg3: memref<1x128xf32, #tpu.memory_space<vmem>>, %arg4: memref<128x128xf32, #tpu.memory_space<vmem>>, %arg5: memref<1x128xf32, #tpu.memory_space<vmem>>, %arg6: memref<128x128xf32, #tpu.memory_space<vmem>>, %arg7: memref<1x128xf32, #tpu.memory_space<vmem>>, %arg8: memref<1x128xf32, #tpu.memory_space<vmem>>, %arg9: memref<1x128xf32, #tpu.memory_space<vmem>>, %arg10: memref<8x128xf32, #tpu.memory_space<vmem>>) attributes {dimension_semantics = [#tpu.dimension_semantics<parallel>], iteration_bounds = array<i64: 1>, scalar_prefetch = 0 : i64, scratch_operands = 0 : i64, tpu.core_type = #tpu.core_type<tc>, window_params = [{transform_indices = @transform_0, window_bounds = array<i64: 8, 128>}, {pipeline_mode = #tpu.pipeline_mode<synchronous>, transform_indices = @transform_1, window_bounds = array<i64: 128, 128>}, {pipeline_mode = #tpu.pipeline_mode<synchronous>, transform_indices = @transform_2, window_bounds = array<i64: 1, 128>}, {pipeline_mode = #tpu.pipeline_mode<synchronous>, transform_indices = @transform_3, window_bounds = array<i64: 128, 128>}, {pipeline_mode = #tpu.pipeline_mode<synchronous>, transform_indices = @transform_4, window_bounds = array<i64: 1, 128>}, {pipeline_mode = #tpu.pipeline_mode<synchronous>, transform_indices = @transform_5, window_bounds = array<i64: 128, 128>}, {pipeline_mode = #tpu.pipeline_mode<synchronous>, transform_indices = @transform_6, window_bounds = array<i64: 1, 128>}, {pipeline_mode = #tpu.pipeline_mode<synchronous>, transform_indices = @transform_7, window_bounds = array<i64: 1, 128>}, {pipeline_mode = #tpu.pipeline_mode<synchronous>, transform_indices = @transform_8, window_bounds = array<i64: 1, 128>}, {transform_indices = @transform_9, window_bounds = array<i64: 8, 128>}]} {
    %c0 = arith.constant 0 : index
    %c0_0 = arith.constant 0 : index
    %0 = vector.load %arg1[%c0, %c0_0] : memref<8x128xf32, #tpu.memory_space<vmem>>, vector<8x128xf32>
    %c0_1 = arith.constant 0 : index
    %c0_2 = arith.constant 0 : index
    %1 = vector.load %arg2[%c0_1, %c0_2] : memref<128x128xf32, #tpu.memory_space<vmem>>, vector<128x128xf32>
    %cst = arith.constant dense<0.000000e+00> : vector<8x128xf32>
    %2 = tpu.matmul %0, %1, %cst {dimension_numbers = #tpu.dot_dimension_numbers<[1], [0], [0], [1], [0, 0, 1, 1], [], []>} : vector<8x128xf32>, vector<128x128xf32>, vector<8x128xf32> -> vector<8x128xf32>
    %c0_3 = arith.constant 0 : index
    %c0_4 = arith.constant 0 : index
    %3 = vector.load %arg3[%c0_3, %c0_4] : memref<1x128xf32, #tpu.memory_space<vmem>>, vector<1x128xf32>
    %4 = vector.broadcast %3 : vector<1x128xf32> to vector<8x128xf32>
    %5 = arith.addf %2, %4 : vector<8x128xf32>
    %cst_5 = arith.constant 0.000000e+00 : f32
    %6 = vector.broadcast %cst_5 : f32 to vector<8x128xf32>
    %7 = arith.maximumf %5, %6 : vector<8x128xf32>
    %c0_6 = arith.constant 0 : index
    %c0_7 = arith.constant 0 : index
    %8 = vector.load %arg4[%c0_6, %c0_7] : memref<128x128xf32, #tpu.memory_space<vmem>>, vector<128x128xf32>
    %cst_8 = arith.constant dense<0.000000e+00> : vector<8x128xf32>
    %9 = tpu.matmul %7, %8, %cst_8 {dimension_numbers = #tpu.dot_dimension_numbers<[1], [0], [0], [1], [0, 0, 1, 1], [], []>} : vector<8x128xf32>, vector<128x128xf32>, vector<8x128xf32> -> vector<8x128xf32>
    %c0_9 = arith.constant 0 : index
    %c0_10 = arith.constant 0 : index
    %10 = vector.load %arg5[%c0_9, %c0_10] : memref<1x128xf32, #tpu.memory_space<vmem>>, vector<1x128xf32>
    %11 = vector.broadcast %10 : vector<1x128xf32> to vector<8x128xf32>
    %12 = arith.addf %9, %11 : vector<8x128xf32>
    %cst_11 = arith.constant 0.000000e+00 : f32
    %13 = vector.broadcast %cst_11 : f32 to vector<8x128xf32>
    %14 = arith.maximumf %12, %13 : vector<8x128xf32>
    %c0_12 = arith.constant 0 : index
    %c0_13 = arith.constant 0 : index
    %15 = vector.load %arg6[%c0_12, %c0_13] : memref<128x128xf32, #tpu.memory_space<vmem>>, vector<128x128xf32>
    %cst_14 = arith.constant dense<0.000000e+00> : vector<8x128xf32>
    %16 = tpu.matmul %14, %15, %cst_14 {dimension_numbers = #tpu.dot_dimension_numbers<[1], [0], [0], [1], [0, 0, 1, 1], [], []>} : vector<8x128xf32>, vector<128x128xf32>, vector<8x128xf32> -> vector<8x128xf32>
    %c0_15 = arith.constant 0 : index
    %c0_16 = arith.constant 0 : index
    %17 = vector.load %arg7[%c0_15, %c0_16] : memref<1x128xf32, #tpu.memory_space<vmem>>, vector<1x128xf32>
    %18 = vector.broadcast %17 : vector<1x128xf32> to vector<8x128xf32>
    %19 = arith.addf %16, %18 : vector<8x128xf32>
    %20 = math.tanh %19 : vector<8x128xf32>
    %c0_17 = arith.constant 0 : index
    %c0_18 = arith.constant 0 : index
    %21 = vector.load %arg8[%c0_17, %c0_18] : memref<1x128xf32, #tpu.memory_space<vmem>>, vector<1x128xf32>
    %22 = vector.broadcast %21 : vector<1x128xf32> to vector<8x128xf32>
    %23 = arith.mulf %20, %22 : vector<8x128xf32>
    %c0_19 = arith.constant 0 : index
    %c0_20 = arith.constant 0 : index
    %24 = vector.load %arg9[%c0_19, %c0_20] : memref<1x128xf32, #tpu.memory_space<vmem>>, vector<1x128xf32>
    %25 = vector.broadcast %24 : vector<1x128xf32> to vector<8x128xf32>
    %26 = arith.addf %23, %25 : vector<8x128xf32>
    %c0_21 = arith.constant 0 : index
    %c0_22 = arith.constant 0 : index
    %27 = vector.load %arg10[%c0_21, %c0_22] : memref<8x128xf32, #tpu.memory_space<vmem>>, vector<8x128xf32>
    tpu.vector_store %arg10[%c0_21, %c0_22], %26 {strides = array<i32>} : memref<8x128xf32, #tpu.memory_space<vmem>>, vector<8x128xf32>,
    return
  }
  func.func @transform_0(%arg0: i32) -> (i32, i32) {
    %c0_i32 = arith.constant 0 : i32
    %c0_i32_0 = arith.constant 0 : i32
    return %arg0, %c0_i32 : i32, i32
  }
  func.func @transform_1(%arg0: i32) -> (i32, i32) {
    %c0_i32 = arith.constant 0 : i32
    %c0_i32_0 = arith.constant 0 : i32
    %c0_i32_1 = arith.constant 0 : i32
    return %c0_i32, %c0_i32_0 : i32, i32
  }
  func.func @transform_2(%arg0: i32) -> (i32, i32) {
    %c0_i32 = arith.constant 0 : i32
    %c0_i32_0 = arith.constant 0 : i32
    %c0_i32_1 = arith.constant 0 : i32
    return %c0_i32, %c0_i32_0 : i32, i32
  }
  func.func @transform_3(%arg0: i32) -> (i32, i32) {
    %c0_i32 = arith.constant 0 : i32
    %c0_i32_0 = arith.constant 0 : i32
    %c0_i32_1 = arith.constant 0 : i32
    return %c0_i32, %c0_i32_0 : i32, i32
  }
  func.func @transform_4(%arg0: i32) -> (i32, i32) {
    %c0_i32 = arith.constant 0 : i32
    %c0_i32_0 = arith.constant 0 : i32
    %c0_i32_1 = arith.constant 0 : i32
    return %c0_i32, %c0_i32_0 : i32, i32
  }
  func.func @transform_5(%arg0: i32) -> (i32, i32) {
    %c0_i32 = arith.constant 0 : i32
    %c0_i32_0 = arith.constant 0 : i32
    %c0_i32_1 = arith.constant 0 : i32
    return %c0_i32, %c0_i32_0 : i32, i32
  }
  func.func @transform_6(%arg0: i32) -> (i32, i32) {
    %c0_i32 = arith.constant 0 : i32
    %c0_i32_0 = arith.constant 0 : i32
    %c0_i32_1 = arith.constant 0 : i32
    return %c0_i32, %c0_i32_0 : i32, i32
  }
  func.func @transform_7(%arg0: i32) -> (i32, i32) {
    %c0_i32 = arith.constant 0 : i32
    %c0_i32_0 = arith.constant 0 : i32
    %c0_i32_1 = arith.constant 0 : i32
    return %c0_i32, %c0_i32_0 : i32, i32
  }
  func.func @transform_8(%arg0: i32) -> (i32, i32) {
    %c0_i32 = arith.constant 0 : i32
    %c0_i32_0 = arith.constant 0 : i32
    %c0_i32_1 = arith.constant 0 : i32
    return %c0_i32, %c0_i32_0 : i32, i32
  }
  func.func @transform_9(%arg0: i32) -> (i32, i32) {
    %c0_i32 = arith.constant 0 : i32
    %c0_i32_0 = arith.constant 0 : i32
    return %arg0, %c0_i32 : i32, i32
  }
}

</mosaic_0001>

<bundles_post_ra>
// kernel: _forward_impl.1
= control target key start
LH: loop header
LB: loop body
LE: loop exit
PB: predicated region body
PF: predicated region fallthrough
CT: control target
= control target key end

     0   :  { %14 = vsyncpa [#allocation3], 0  ;;  %s754_s0 = inlined_call_operand.vmem [shape: f32[8,128], index: 0, kind: input, shape index: {}]   ;;  %s755_s1 = inlined_call_operand.hbm [shape: f32[128,128], index: 1, kind: input, shape index: {}]   ;;  %s756_s2 = inlined_call_operand.vmem [shape: f32[1,128], index: 2, kind: input, shape index: {}]   ;;  %s757_s3 = inlined_call_operand.hbm [shape: f32[128,128], index: 3, kind: input, shape index: {}]   ;;  %s758_s4 = inlined_call_operand.vmem [shape: f32[1,128], index: 4, kind: input, shape index: {}]   ;;  %s759_s5 = inlined_call_operand.hbm [shape: f32[128,128], index: 5, kind: input, shape index: {}]   ;;  %s760_s6 = inlined_call_operand.vmem [shape: f32[1,128], index: 6, kind: input, shape index: {}]   ;;  %s761_s7 = inlined_call_operand.vmem [shape: f32[1,128], index: 7, kind: input, shape index: {}]   ;;  %s762_s8 = inlined_call_operand.vmem [shape: f32[1,128], index: 8, kind: input, shape index: {}]   ;;  %s763_s9 = inlined_call_operand.vmem [shape: f32[8,128], index: 9, kind: output, shape index: {}]  }
   0x1   :  { %15 = vsyncpa [#allocation5], 0  ;;  %s613_s30 = smov [#allocation4]   ;;  %s614_s11 = smov [#allocation2]  }
   0x2   :  { %s37_s10 = sshll.u32 %s613_s30, 4  ;;  %s23_s12 = sshll.u32 %s614_s11, 4  ;;  %s38_s10 = int_to_ptr.vmem [resolvable:$true] %s37_s10  ;;  %s24_s12 = int_to_ptr.vmem [resolvable:$true] %s23_s12 }
   0x3   :  { %s557_s13 = scalar_lea.vmem %s38_s10, 2048  ;;  %p562_p1 = scmp.lt.s32.totalorder %s38_s10, %s38_s10 }
   0x4   :  { %p558_p0 = scmp.ne.s32.totalorder %s38_s10, %s557_s13  ;;  %p563_p2 = scmp.lt.s32.totalorder %s557_s13, %s557_s13 }
   0x6   :  { %p564_p3 = por %p563_p2, %p562_p1 }
   0x8   :  { %p565_p4 = pnand %p564_p3, %p558_p0 }
   0xa   :  { %568 = shalt.err (!%p565_p4)
}
   0xb   :  { %s615_s14 = smov 128   ;;  %s616_s15 = smov 8  }
   0xc   :  { %43 = dma.hbm_to_vmem [thread:$0]  %s757_s3, 2048, %s38_s10, [#allocation5], %s615_s14, %s615_s14, %s616_s15  }
   0xd   :  { %s577_s18 = scalar_lea.vmem %s24_s12, 2048  ;;  %p582_p6 = scmp.lt.s32.totalorder %s24_s12, %s24_s12 }
   0xe   :  { %p578_p5 = scmp.ne.s32.totalorder %s24_s12, %s577_s18  ;;  %p583_p7 = scmp.lt.s32.totalorder %s577_s18, %s577_s18 }
  0x10   :  { %p584_p8 = por %p583_p7, %p582_p6 }
  0x12   :  { %p585_p9 = pnand %p584_p8, %p578_p5 }
  0x14   :  { %588 = shalt.err (!%p585_p9)
}
  0x15   :  { %29 = dma.hbm_to_vmem [thread:$0]  %s755_s1, 2048, %s24_s12, [#allocation3], %s615_s14, %s615_s14, %s616_s15  }
  0x16   :  { %s617_s21 = smov [#allocation6]  }
  0x17   :  { %s51_s22 = sshll.u32 %s617_s21, 4  ;;  %s52_s22 = int_to_ptr.vmem [resolvable:$true] %s51_s22 }
  0x18   :  { %s597_s23 = scalar_lea.vmem %s52_s22, 2048  ;;  %p602_p11 = scmp.lt.s32.totalorder %s52_s22, %s52_s22 }
  0x19   :  { %p598_p10 = scmp.ne.s32.totalorder %s52_s22, %s597_s23  ;;  %p603_p12 = scmp.lt.s32.totalorder %s597_s23, %s597_s23 }
  0x1b   :  { %p604_p13 = por %p603_p12, %p602_p11 }
  0x1d   :  { %p605_p0 = pnand %p604_p13, %p598_p10 }
  0x1f   :  { %608 = shalt.err (!%p605_p0)
}
  0x20   :  { %57 = dma.hbm_to_vmem [thread:$0]  %s759_s5, 2048, %s52_s22, [#allocation5], %s615_s14, %s615_s14, %s616_s15  }
  0x21   :  { %609 = dma.done.wait [#allocation3], 2048  }
  0x22   :  { %610 = vsyncadd [#allocation3], 4294965248 }
  0x23   :  { %611 = dma.done.wait [#allocation5], 4096  }
  0x24   :  { %612 = vsyncadd [#allocation5], 4294963200  ;;  %v618_v0 = vmov 0.0   ;;  %vm619_vm0 = vmmov 0   ;;  %v89_v1 = vld [vmem:[#allocation2 + $0x78] sm:$0xff]  ;;  %v88_v2 = vld [vmem:[#allocation2 + $0x70] sm:$0xff] }
  0x25   :  { %435 = vmatprep.subr.mxu0 %v618_v0  ;;  %467 = vmatprep.mubr.msk.f32.mxu0 %vm619_vm0, %v618_v0  ;;  %v87_v3 = vld [vmem:[#allocation2 + $0x68] sm:$0xff]  ;;  %v86_v4 = vld [vmem:[#allocation2 + $0x60] sm:$0xff]  ;;  %v183_v5 = vld [vmem:[#allocation4 + $0x78] sm:$0xff] }
  0x26   :  { %470 = vmatprep.subr.mxu1 %v618_v0  ;;  %502 = vmatprep.mubr.msk.f32.mxu1 %vm619_vm0, %v618_v0  ;;  %v85_v6 = vld [vmem:[#allocation2 + $0x58] sm:$0xff]  ;;  %v182_v7 = vld [vmem:[#allocation4 + $0x70] sm:$0xff]  ;;  %v181_v8 = vld [vmem:[#allocation4 + $0x68] sm:$0xff] }
  0x27   :  { %436 = vmatpush3.msra.mxu0 %v89_v1  ;;  %471 = vmatpush3.msra.mxu1 %v183_v5  ;;  %v84_v9 = vld [vmem:[#allocation2 + $0x50] sm:$0xff]  ;;  %v180_v10 = vld [vmem:[#allocation4 + $0x60] sm:$0xff]  ;;  %v83_v11 = vld [vmem:[#allocation2 + $0x48] sm:$0xff] }
  0x28   :  { %437 = vmatprep.subr.mxu0 %v618_v0  ;;  %472 = vmatprep.subr.mxu1 %v618_v0  ;;  %v179_v12 = vld [vmem:[#allocation4 + $0x58] sm:$0xff]  ;;  %v82_v13 = vld [vmem:[#allocation2 + $0x40] sm:$0xff]  ;;  %v178_v14 = vld [vmem:[#allocation4 + $0x50] sm:$0xff] }
  0x29   :  { %438 = vmatpush3.msra.mxu0 %v88_v2  ;;  %473 = vmatpush3.msra.mxu1 %v182_v7  ;;  %v81_v15 = vld [vmem:[#allocation2 + $0x38] sm:$0xff]  ;;  %v177_v16 = vld [vmem:[#allocation4 + $0x48] sm:$0xff]  ;;  %v80_v17 = vld [vmem:[#allocation2 + $0x30] sm:$0xff] }
  0x2a   :  { %439 = vmatprep.subr.mxu0 %v618_v0  ;;  %474 = vmatprep.subr.mxu1 %v618_v0  ;;  %v176_v18 = vld [vmem:[#allocation4 + $0x40] sm:$0xff]  ;;  %v79_v19 = vld [vmem:[#allocation2 + $0x28] sm:$0xff]  ;;  %v175_v20 = vld [vmem:[#allocation4 + $0x38] sm:$0xff] }
  0x2b   :  { %440 = vmatpush3.msra.mxu0 %v87_v3  ;;  %475 = vmatpush3.msra.mxu1 %v181_v8  ;;  %v78_v21 = vld [vmem:[#allocation2 + $0x20] sm:$0xff]  ;;  %v174_v22 = vld [vmem:[#allocation4 + $0x30] sm:$0xff]  ;;  %v77_v23 = vld [vmem:[#allocation2 + $0x18] sm:$0xff] }
  0x2c   :  { %441 = vmatprep.subr.mxu0 %v618_v0  ;;  %476 = vmatprep.subr.mxu1 %v618_v0  ;;  %v173_v24 = vld [vmem:[#allocation4 + $0x28] sm:$0xff]  ;;  %v76_v25 = vld [vmem:[#allocation2 + $0x10] sm:$0xff]  ;;  %v172_v26 = vld [vmem:[#allocation4 + $0x20] sm:$0xff] }
  0x2d   :  { %442 = vmatpush3.msra.mxu0 %v86_v4  ;;  %477 = vmatpush3.msra.mxu1 %v180_v10  ;;  %v75_v27 = vld [vmem:[#allocation2 + $0x8] sm:$0xff]  ;;  %v171_v28 = vld [vmem:[#allocation4 + $0x18] sm:$0xff]  ;;  %v74_v29 = vld [vmem:[#allocation2] sm:$0xff] }
  0x2e   :  { %443 = vmatprep.subr.mxu0 %v618_v0  ;;  %478 = vmatprep.subr.mxu1 %v618_v0  ;;  %v73_v30 = vld [vmem:[%s754_s0] sm:$0xff]  ;;  %v170_v31 = vld [vmem:[#allocation4 + $0x10] sm:$0xff]  ;;  %v169_v32 = vld [vmem:[#allocation4 + $0x8] sm:$0xff] }
  0x2f   :  { %444 = vmatpush3.msra.mxu0 %v85_v6  ;;  %479 = vmatpush3.msra.mxu1 %v179_v12  ;;  %v168_v33 = vld [vmem:[#allocation4] sm:$0xff]  ;;  %v277_v34 = vld [vmem:[#allocation6 + $0x78] sm:$0xff]  ;;  %v276_v35 = vld [vmem:[#allocation6 + $0x70] sm:$0xff] }
  0x30   :  { %445 = vmatprep.subr.mxu0 %v618_v0  ;;  %480 = vmatprep.subr.mxu1 %v618_v0  ;;  %v275_v36 = vld [vmem:[#allocation6 + $0x68] sm:$0xff]  ;;  %v274_v37 = vld [vmem:[#allocation6 + $0x60] sm:$0xff]  ;;  %v273_v38 = vld [vmem:[#allocation6 + $0x58] sm:$0xff] }
  0x31   :  { %446 = vmatpush3.msra.mxu0 %v84_v9  ;;  %481 = vmatpush3.msra.mxu1 %v178_v14  ;;  %v272_v39 = vld [vmem:[#allocation6 + $0x50] sm:$0xff]  ;;  %v271_v40 = vld [vmem:[#allocation6 + $0x48] sm:$0xff]  ;;  %v270_v41 = vld [vmem:[#allocation6 + $0x40] sm:$0xff] }
  0x32   :  { %447 = vmatprep.subr.mxu0 %v618_v0  ;;  %482 = vmatprep.subr.mxu1 %v618_v0  ;;  %v269_v42 = vld [vmem:[#allocation6 + $0x38] sm:$0xff]  ;;  %v268_v43 = vld [vmem:[#allocation6 + $0x30] sm:$0xff]  ;;  %v267_v44 = vld [vmem:[#allocation6 + $0x28] sm:$0xff] }
  0x33   :  { %448 = vmatpush3.msra.mxu0 %v83_v11  ;;  %483 = vmatpush3.msra.mxu1 %v177_v16  ;;  %v266_v45 = vld [vmem:[#allocation6 + $0x20] sm:$0xff]  ;;  %v265_v46 = vld [vmem:[#allocation6 + $0x18] sm:$0xff]  ;;  %v264_v52 = vld [vmem:[#allocation6 + $0x10] sm:$0xff] }
  0x34   :  { %449 = vmatprep.subr.mxu0 %v618_v0  ;;  %484 = vmatprep.subr.mxu1 %v618_v0  ;;  %v379_v47 = vld [vmem:[%s756_s2] ss:$0 sm:$0xff]  ;;  %v263_v53 = vld [vmem:[#allocation6 + $0x8] sm:$0xff] }
  0x35   :  { %450 = vmatpush3.msra.mxu0 %v82_v13  ;;  %485 = vmatpush3.msra.mxu1 %v176_v18  ;;  %v262_v54 = vld [vmem:[#allocation6] sm:$0xff] }
  0x36   :  { %451 = vmatprep.subr.mxu0 %v618_v0  ;;  %486 = vmatprep.subr.mxu1 %v618_v0  ;;  %v380_v55 = vld [vmem:[%s758_s4] ss:$0 sm:$0xff] }
  0x37   :  { %452 = vmatpush3.msra.mxu0 %v81_v15  ;;  %487 = vmatpush3.msra.mxu1 %v175_v20  ;;  %v381_v60 = vld [vmem:[%s760_s6] ss:$0 sm:$0xff] }
  0x38   :  { %453 = vmatprep.subr.mxu0 %v618_v0  ;;  %488 = vmatprep.subr.mxu1 %v618_v0  ;;  %v383_v2 = vld [vmem:[%s762_s8] ss:$0 sm:$0xff] }
  0x39   :  { %454 = vmatpush3.msra.mxu0 %v80_v17  ;;  %489 = vmatpush3.msra.mxu1 %v174_v22 }
  0x3a   :  { %455 = vmatprep.subr.mxu0 %v618_v0  ;;  %490 = vmatprep.subr.mxu1 %v618_v0 }
  0x3b   :  { %456 = vmatpush3.msra.mxu0 %v79_v19  ;;  %491 = vmatpush3.msra.mxu1 %v173_v24 }
  0x3c   :  { %457 = vmatprep.subr.mxu0 %v618_v0  ;;  %492 = vmatprep.subr.mxu1 %v618_v0 }
  0x3d   :  { %458 = vmatpush3.msra.mxu0 %v78_v21  ;;  %493 = vmatpush3.msra.mxu1 %v172_v26 }
  0x3e   :  { %459 = vmatprep.subr.mxu0 %v618_v0  ;;  %494 = vmatprep.subr.mxu1 %v618_v0 }
  0x3f   :  { %460 = vmatpush3.msra.mxu0 %v77_v23  ;;  %495 = vmatpush3.msra.mxu1 %v171_v28 }
  0x40   :  { %461 = vmatprep.subr.mxu0 %v618_v0  ;;  %496 = vmatprep.subr.mxu1 %v618_v0 }
  0x41   :  { %462 = vmatpush3.msra.mxu0 %v76_v25  ;;  %497 = vmatpush3.msra.mxu1 %v170_v31 }
  0x42   :  { %463 = vmatprep.subr.mxu0 %v618_v0  ;;  %498 = vmatprep.subr.mxu1 %v618_v0 }
  0x43   :  { %464 = vmatpush3.msra.mxu0 %v75_v27  ;;  %499 = vmatpush3.msra.mxu1 %v169_v32 }
  0x44   :  { %465 = vmatprep.subr.mxu0 %v618_v0  ;;  %500 = vmatprep.subr.mxu1 %v618_v0 }
  0x45   :  { %466 = vmatpush3.msra.mxu0 %v74_v29  ;;  %501 = vmatpush3.msra.mxu1 %v168_v33 }
  0x46   :  { %468 = vmatmul.mubr.f32.vlgmr.msra.gmra.mxu0 %v73_v30  ;;  %505 = vmatprep.subr.mxu0 %v618_v0 }
  0x47   :  { %537 = vmatprep.mubr.msk.f32.mxu0 %vm619_vm0, %v618_v0  ;;  %506 = vmatpush3.msra.mxu0 %v277_v34 }
  0x48   :  { %507 = vmatprep.subr.mxu0 %v618_v0 }
  0x49   :  { %508 = vmatpush3.msra.mxu0 %v276_v35 }
  0x4a   :  { %509 = vmatprep.subr.mxu0 %v618_v0 }
  0x4b   :  { %510 = vmatpush3.msra.mxu0 %v275_v36 }
  0x4c   :  { %511 = vmatprep.subr.mxu0 %v618_v0 }
  0x4d   :  { %512 = vmatpush3.msra.mxu0 %v274_v37 }
  0x4e   :  { %513 = vmatprep.subr.mxu0 %v618_v0 }
  0x4f   :  { %514 = vmatpush3.msra.mxu0 %v273_v38 }
  0x50   :  { %515 = vmatprep.subr.mxu0 %v618_v0 }
  0x51   :  { %516 = vmatpush3.msra.mxu0 %v272_v39 }
  0x52   :  { %517 = vmatprep.subr.mxu0 %v618_v0 }
  0x53   :  { %518 = vmatpush3.msra.mxu0 %v271_v40 }
  0x54   :  { %519 = vmatprep.subr.mxu0 %v618_v0 }
  0x55   :  { %520 = vmatpush3.msra.mxu0 %v270_v41 }
  0x56   :  { %521 = vmatprep.subr.mxu0 %v618_v0 }
  0x57   :  { %522 = vmatpush3.msra.mxu0 %v269_v42 }
  0x58   :  { %523 = vmatprep.subr.mxu0 %v618_v0 }
  0x59   :  { %524 = vmatpush3.msra.mxu0 %v268_v43 }
  0x5a   :  { %525 = vmatprep.subr.mxu0 %v618_v0 }
  0x5b   :  { %526 = vmatpush3.msra.mxu0 %v267_v44 }
  0x5c   :  { %527 = vmatprep.subr.mxu0 %v618_v0 }
  0x5d   :  { %528 = vmatpush3.msra.mxu0 %v266_v45 }
  0x5e   :  { %529 = vmatprep.subr.mxu0 %v618_v0 }
  0x5f   :  { %530 = vmatpush3.msra.mxu0 %v265_v46 }
  0x60   :  { %531 = vmatprep.subr.mxu0 %v618_v0 }
  0x61   :  { %532 = vmatpush3.msra.mxu0 %v264_v52 }
  0x62   :  { %533 = vmatprep.subr.mxu0 %v618_v0 }
  0x63   :  { %534 = vmatpush3.msra.mxu0 %v263_v53 }
  0x64   :  { %535 = vmatprep.subr.mxu0 %v618_v0  ;;  %v382_v0 = vld [vmem:[%s761_s7] ss:$0 sm:$0xff] }
  0x65   :  { %536 = vmatpush3.msra.mxu0 %v262_v54 }
 0x106   :  { %v163_v48 = vpop.f32.mrf.mxu0 }
 0x107   :  { %v164_v49 = vadd.f32 %v379_v47, %v163_v48 }
 0x108   :  { %v469_v50 = vpop.f32.mrf.mxu0 }
 0x109   :  { %v167_v51 = vmax.f32 %v164_v49, 0.0 }
 0x10b   :  { %503 = vmatmul.mubr.f32.vlgmr.msra.gmra.mxu1 %v167_v51 }
 0x1cb   :  { %v257_v56 = vpop.f32.mrf.mxu1 }
 0x1cc   :  { %v258_v57 = vadd.f32 %v380_v55, %v257_v56 }
 0x1cd   :  { %v504_v58 = vpop.f32.mrf.mxu1 }
 0x1ce   :  { %v261_v59 = vmax.f32 %v258_v57, 0.0 }
 0x1d0   :  { %538 = vmatmul.mubr.f32.vlgmr.msra.gmra.mxu0 %v261_v59 }
 0x290   :  { %v351_v61 = vpop.f32.mrf.mxu0 }
 0x291   :  { %v352_v62 = vadd.f32 %v381_v60, %v351_v61 }
 0x292   :  { %v539_v63 = vpop.f32.mrf.mxu0 }
 0x293   :  { %547 = vtanh.f32 %v352_v62 }
 0x2a0   :  { %v548_v1 = vpop.eup %547 }
 0x2a1   :  { %v363_v3 = vmul.f32 %v548_v1, %v382_v0 }
 0x2a3   :  { %v371_v4 = vadd.f32 %v383_v2, %v363_v3 }
 0x2a5   :  { %372 = vst [vmem:[%s763_s9] sm:$0xff] %v371_v4 }
 0x2a6   :  { %377 = vsyncpa [#allocation3], 1 }
 0x2a7   :  { %378 = vsyncpa [#allocation5], 1 }

</bundles_post_ra>
